<compile_context>
chip_gen: v7x
topology: tpu7x:2x2x1
jax: 0.10.0
libtpu: 0.0.40
codegen_flags: <defaults>
</compile_context>

<pallas_src>
import jax
import jax.numpy as jnp
from jax.experimental import pallas as pl
from jax.experimental.pallas import tpu as pltpu


def _cdiv(a, b):
    return (a + b - 1) // b


def _ensemble_kernel(x_ref, w_ref, b_ref, od_ref, ol_ref):
    # x_ref: (Cin, T)    pixels-on-lanes tile
    # w_ref: (Ccat, Cin) ensemble-averaged fused head weights (resident)
    # b_ref: (Ccat, 1)   ensemble-averaged fused biases (resident)
    # od_ref: (Cd, T), ol_ref: (Cl, T)
    acc = jnp.dot(w_ref[...], x_ref[...], preferred_element_type=jnp.float32)
    acc = acc + b_ref[...]

    cd = od_ref.shape[0]
    cl = ol_ref.shape[0]
    cdp = ((cd + 7) // 8) * 8                 # sublane-aligned split point
    od_ref[...] = acc[:cd, :].astype(od_ref.dtype)
    ol_ref[...] = acc[cdp:cdp + cl, :].astype(ol_ref.dtype)


def _pick_pixel_tile(P, batch, cap):
    """Lane-dense (multiple-of-128) pixel tile near `cap`; shrink only to keep
    >= 4 total grid steps when the problem size allows (megacore/pipelining)."""
    cap = max(128, (cap // 128) * 128)
    p128 = _cdiv(P, 128) * 128
    t = min(cap, p128)
    while batch * _cdiv(p128, t) < 4 and t > 128:
        t = max(128, ((t // 2) // 128) * 128)
    return t


def ensembler_forward(x_nchw, w_dmg, b_dmg, w_loc, b_loc, *, tile_cap=65536):
    """x_nchw: (B, Cin, H, W). w_*: (N, Cin, Cout_*). b_*: (N, 1, Cout_*)."""
    B, Cin, H, W = x_nchw.shape
    N, _, Cd = w_dmg.shape
    Cl = w_loc.shape[-1]
    P = H * W

    # --- tile selection + pixel padding (robust to any H*W) -----------------
    T = _pick_pixel_tile(P, B, tile_cap)
    P_pad = _cdiv(P, T) * T

    # NCHW -> (B, Cin, H*W): free reshape, pixels land on the lanes.
    x = x_nchw.reshape(B, Cin, P)
    if P_pad != P:
        x = jnp.pad(x, ((0, 0), (0, 0), (0, P_pad - P)))

    # --- fuse heads along Cout, pre-sum the ensemble in the wrapper ---------
    # Pad the damage head to 8 columns so the in-kernel split is tile-aligned.
    Cdp = ((Cd + 7) // 8) * 8
    Ccat = Cdp + Cl
    w_cat = jnp.zeros((N, Cin, Ccat), w_dmg.dtype)
    w_cat = w_cat.at[:, :, :Cd].set(w_dmg).at[:, :, Cdp:].set(w_loc)
    b_cat = jnp.zeros((N, Ccat), b_dmg.dtype)
    b_cat = b_cat.at[:, :Cd].set(b_dmg[:, 0, :]).at[:, Cdp:].set(b_loc[:, 0, :])

    # (1/N) * sum_m (W_m x + b_m) == ((1/N) sum_m W_m) x + (1/N) sum_m b_m
    inv_n = 1.0 / N
    w_sum = jnp.transpose(jnp.sum(w_cat, axis=0) * inv_n, (1, 0))   # (Ccat, Cin)
    b_sum = (jnp.sum(b_cat, axis=0) * inv_n)[:, None]               # (Ccat, 1)

    grid = (B, P_pad // T)

    # VMEM budget: ~256 bytes/pixel-of-tile (x + 2 outputs double-buffered,
    # padded to 8 sublanes, + 16-row f32 accumulator).  Cap at 48 MiB so we
    # never approach v7x's 64 MiB/TC; floor at the 32 MiB scoped default.
    vmem_bytes = min(48 * 1024 * 1024, max(32 * 1024 * 1024, 320 * T))

    out_d, out_l = pl.pallas_call(
        _ensemble_kernel,
        out_shape=(jax.ShapeDtypeStruct((B, Cd, P_pad), x.dtype),
                   jax.ShapeDtypeStruct((B, Cl, P_pad), x.dtype)),
        grid_spec=pltpu.PrefetchScalarGridSpec(
            num_scalar_prefetch=0,
            grid=grid,
            in_specs=[
                # x tile: (Cin, T), pixels on lanes
                pl.BlockSpec((pl.Squeezed(), Cin, T), lambda b, i: (b, 0, i)),
                # ensemble-averaged fused weights, resident (constant index)
                pl.BlockSpec((Ccat, Cin), lambda b, i: (0, 0)),
                # ensemble-averaged fused biases, resident
                pl.BlockSpec((Ccat, 1), lambda b, i: (0, 0)),
            ],
            out_specs=[
                pl.BlockSpec((pl.Squeezed(), Cd, T), lambda b, i: (b, 0, i)),
                pl.BlockSpec((pl.Squeezed(), Cl, T), lambda b, i: (b, 0, i)),
            ],
        ),
        compiler_params=pltpu.CompilerParams(
            dimension_semantics=("parallel", "parallel"),
            vmem_limit_bytes=vmem_bytes),
    )(x, w_sum, b_sum)

    # Drop pixel padding, then free reshape back to (B, Cout, H, W).
    out_d = out_d[:, :, :P].reshape(B, Cd, H, W)
    out_l = out_l[:, :, :P].reshape(B, Cl, H, W)
    return {"damage": out_d, "loc": out_l}


def _reference(x_nchw, w_dmg, b_dmg, w_loc, b_loc):
    """Plain-JAX replica of the PyTorch Ensembler.forward loop (NCHW)."""
    N = w_dmg.shape[0]

    def member(m):
        def head(w, b):
            y = jnp.einsum('bchw,cd->bdhw', x_nchw, w[m],
                           precision=jax.lax.Precision.HIGHEST)
            return y + b[m, 0][None, :, None, None]
        return {"damage": head(w_dmg, b_dmg), "loc": head(w_loc, b_loc)}

    out0 = member(0)
    for m in range(1, N):
        oi = member(m)
        for key in ("damage", "loc"):
            out0[key] = out0[key] + oi[key]
    scale = 1.0 / N
    return {key: out0[key] * scale for key in out0}


if __name__ == "__main__":
    # TODO(synk): member models are synthetic 1x1-conv heads, not full
    # segmentation networks; the ensemble sum/scale semantics are exact.
    key = jax.random.PRNGKey(0)
    B, Cin, H, W = 2, 4, 16, 16
    N_MODELS = 3
    C_DMG, C_LOC = 5, 2

    k_x, k_wd, k_bd, k_wl, k_bl = jax.random.split(key, 5)
    x = jax.random.normal(k_x, (B, Cin, H, W), dtype=jnp.float32)
    w_dmg = jax.random.normal(k_wd, (N_MODELS, Cin, C_DMG), dtype=jnp.float32) * 0.1
    b_dmg = jax.random.normal(k_bd, (N_MODELS, 1, C_DMG), dtype=jnp.float32) * 0.1
    w_loc = jax.random.normal(k_wl, (N_MODELS, Cin, C_LOC), dtype=jnp.float32) * 0.1
    b_loc = jax.random.normal(k_bl, (N_MODELS, 1, C_LOC), dtype=jnp.float32) * 0.1

    out = ensembler_forward(x, w_dmg, b_dmg, w_loc, b_loc)
    jax.block_until_ready(out)

    ref = _reference(x, w_dmg, b_dmg, w_loc, b_loc)
    for k in ("damage", "loc"):
        assert out[k].shape == ref[k].shape, (k, out[k].shape, ref[k].shape)
        assert jnp.allclose(out[k], ref[k], atol=1e-4, rtol=1e-4), k

    print("KERNEL_OK")
</pallas_src>

<mosaic_0001>
module attributes {stable_mosaic.version = 11 : i64} {
  func.func @_ensemble_kernel(%arg0: i32, %arg1: i32, %arg2: memref<1x4x128xf32, #tpu.memory_space<vmem>>, %arg3: memref<10x4xf32, #tpu.memory_space<vmem>>, %arg4: memref<10x1xf32, #tpu.memory_space<vmem>>, %arg5: memref<1x5x128xf32, #tpu.memory_space<vmem>>, %arg6: memref<1x2x128xf32, #tpu.memory_space<vmem>>) attributes {dimension_semantics = [#tpu.dimension_semantics<parallel>, #tpu.dimension_semantics<parallel>], iteration_bounds = array<i64: 2, 2>, scalar_prefetch = 0 : i64, scratch_operands = 0 : i64, tpu.core_type = #tpu.core_type<tc>, window_params = [{transform_indices = @transform_0, window_bounds = array<i64: 1, 4, 128>}, {pipeline_mode = #tpu.pipeline_mode<synchronous>, transform_indices = @transform_1, window_bounds = array<i64: 10, 4>}, {pipeline_mode = #tpu.pipeline_mode<synchronous>, transform_indices = @transform_2, window_bounds = array<i64: 10, 1>}, {transform_indices = @transform_3, window_bounds = array<i64: 1, 5, 128>}, {transform_indices = @transform_4, window_bounds = array<i64: 1, 2, 128>}]} {
    %c0 = arith.constant 0 : index
    %c0_0 = arith.constant 0 : index
    %0 = vector.load %arg3[%c0, %c0_0] : memref<10x4xf32, #tpu.memory_space<vmem>>, vector<10x4xf32>
    %c0_1 = arith.constant 0 : index
    %c0_2 = arith.constant 0 : index
    %c0_3 = arith.constant 0 : index
    %1 = vector.load %arg2[%c0_1, %c0_2, %c0_3] : memref<1x4x128xf32, #tpu.memory_space<vmem>>, vector<1x4x128xf32>
    %2 = vector.shape_cast %1 : vector<1x4x128xf32> to vector<4x128xf32>
    %cst = arith.constant dense<0.000000e+00> : vector<10x128xf32>
    %3 = tpu.matmul %0, %2, %cst {dimension_numbers = #tpu.dot_dimension_numbers<[1], [0], [0], [1], [0, 0, 1, 1], [], []>} : vector<10x4xf32>, vector<4x128xf32>, vector<10x128xf32> -> vector<10x128xf32>
    %c0_4 = arith.constant 0 : index
    %c0_5 = arith.constant 0 : index
    %4 = vector.load %arg4[%c0_4, %c0_5] : memref<10x1xf32, #tpu.memory_space<vmem>>, vector<10x1xf32>
    %5 = vector.broadcast %4 : vector<10x1xf32> to vector<10x128xf32>
    %6 = arith.addf %3, %5 : vector<10x128xf32>
    %7 = vector.extract_strided_slice %6 {offsets = [0, 0], sizes = [5, 128], strides = [1, 1]} : vector<10x128xf32> to vector<5x128xf32>
    %c0_6 = arith.constant 0 : index
    %c0_7 = arith.constant 0 : index
    %c0_8 = arith.constant 0 : index
    %8 = vector.load %arg5[%c0_6, %c0_7, %c0_8] : memref<1x5x128xf32, #tpu.memory_space<vmem>>, vector<1x5x128xf32>
    %9 = vector.shape_cast %8 : vector<1x5x128xf32> to vector<5x128xf32>
    %10 = vector.shape_cast %7 : vector<5x128xf32> to vector<1x5x128xf32>
    tpu.vector_store %arg5[%c0_6, %c0_7, %c0_8], %10 {strides = array<i32>} : memref<1x5x128xf32, #tpu.memory_space<vmem>>, vector<1x5x128xf32>,
    %11 = vector.extract_strided_slice %6 {offsets = [8, 0], sizes = [2, 128], strides = [1, 1]} : vector<10x128xf32> to vector<2x128xf32>
    %c0_9 = arith.constant 0 : index
    %c0_10 = arith.constant 0 : index
    %c0_11 = arith.constant 0 : index
    %12 = vector.load %arg6[%c0_9, %c0_10, %c0_11] : memref<1x2x128xf32, #tpu.memory_space<vmem>>, vector<1x2x128xf32>
    %13 = vector.shape_cast %12 : vector<1x2x128xf32> to vector<2x128xf32>
    %14 = vector.shape_cast %11 : vector<2x128xf32> to vector<1x2x128xf32>
    tpu.vector_store %arg6[%c0_9, %c0_10, %c0_11], %14 {strides = array<i32>} : memref<1x2x128xf32, #tpu.memory_space<vmem>>, vector<1x2x128xf32>,
    return
  }
  func.func @transform_0(%arg0: i32, %arg1: i32) -> (i32, i32, i32) {
    %c0_i32 = arith.constant 0 : i32
    %c0_i32_0 = arith.constant 0 : i32
    return %arg0, %c0_i32, %arg1 : i32, i32, i32
  }
  func.func @transform_1(%arg0: i32, %arg1: i32) -> (i32, i32) {
    %c0_i32 = arith.constant 0 : i32
    %c0_i32_0 = arith.constant 0 : i32
    %c0_i32_1 = arith.constant 0 : i32
    return %c0_i32, %c0_i32_0 : i32, i32
  }
  func.func @transform_2(%arg0: i32, %arg1: i32) -> (i32, i32) {
    %c0_i32 = arith.constant 0 : i32
    %c0_i32_0 = arith.constant 0 : i32
    %c0_i32_1 = arith.constant 0 : i32
    return %c0_i32, %c0_i32_0 : i32, i32
  }
  func.func @transform_3(%arg0: i32, %arg1: i32) -> (i32, i32, i32) {
    %c0_i32 = arith.constant 0 : i32
    %c0_i32_0 = arith.constant 0 : i32
    return %arg0, %c0_i32, %arg1 : i32, i32, i32
  }
  func.func @transform_4(%arg0: i32, %arg1: i32) -> (i32, i32, i32) {
    %c0_i32 = arith.constant 0 : i32
    %c0_i32_0 = arith.constant 0 : i32
    return %arg0, %c0_i32, %arg1 : i32, i32, i32
  }
}

</mosaic_0001>

<bundles_post_ra>
// kernel: tpu_custom_call.1
= control target key start
LH: loop header
LB: loop body
LE: loop exit
PB: predicated region body
PF: predicated region fallthrough
CT: control target
= control target key end

     0   :  { %s862_s0 = inlined_call_operand.vmem [shape: f32[2,4,256], index: 0, kind: input, shape index: {}]   ;;  %s863_s1 = inlined_call_operand.vmem [shape: f32[10,4], index: 1, kind: input, shape index: {}]   ;;  %s864_s2 = inlined_call_operand.vmem [shape: f32[10,1], index: 2, kind: input, shape index: {}]   ;;  %s865_s3 = inlined_call_operand.vmem [shape: f32[2,5,256], index: 3, kind: output, shape index: {0}]   ;;  %s866_s4 = inlined_call_operand.hbm [shape: f32[2,2,256], index: 4, kind: output, shape index: {1}]  }
   0x1   :  { %867 = sst [smem:[#allocation5_spill]] %s862_s0 }
   0x2   :  { %868 = sst [smem:[#allocation6_spill]] %s864_s2 }
   0x3   :  { %10 = vsyncpa [#allocation3], 0 }
   0x4   :  { %12 = vsyncpa [#allocation3 + $0x1], 0  ;;  %s708_s15 = smov 0   ;;  %s710_s16 = smov 0  }
   0x5   :  { %s712_s17 = smov 0   ;;  %s714_s18 = smov 0  }
   0x6   :  { %s716_s19 = smov 0   ;;  %s718_s20 = smov 0  }
   0x7   :  { %s720_s21 = smov 0   ;;  %s722_s22 = smov 0  }
   0x8 LB: > { %s486_s23 = sadd.s32 4294967295, %s679_s22   ;;  %s487_s24 = sadd.s32 4294967294, %s679_s22   ;;  %s679_s22 = sphi %s722_s22, %s18_s22   ;;  %s675_s21 = sphi %s720_s21, %s879_s21   ;;  %s671_s20 = sphi %s718_s20, %s878_s20   ;;  %s667_s19 = sphi %s716_s19, %s877_s19   ;;  %s663_s18 = sphi %s714_s18, %s876_s18   ;;  %s659_s17 = sphi %s712_s17, %s875_s17   ;;  %s655_s16 = sphi %s710_s16, %s874_s16   ;;  %s651_s15 = sphi %s708_s15, %s873_s15  }
   0x9   : > { %s27_s25 = sadd.s32 1, %s671_s20  ;;  %s30_s26 = sadd.s32 1, %s675_s21 }
   0xa   : > { %p28_p0 = scmp.ge.s32.totalorder %s27_s25, 2  ;;  %p147_p1 = scmp.ne.s32.totalorder %s659_s17, %s655_s16 }
   0xb   : > { %p148_p2 = scmp.eq.s32.totalorder %s486_s23, 3  ;;  %p153_p5 = scmp.ne.s32.totalorder %s655_s16, %s651_s15 }
   0xc   : > { %s881_s25 = smov (%p28_p0, %s27_s25), 0  ;;  %s883_s26 = smov (!%p28_p0, %s30_s26), %s675_s21 }
   0xd   : > { %s133_s27 = ssub.s32 %s671_s20, %s881_s25  ;;  %p759_p3 = por %p148_p2, %p147_p1 }
   0xe   : > { %p32_p4 = scmp.ge.s32.totalorder %s883_s26, 2  ;;  %p154_p6 = scmp.eq.s32.totalorder %s487_s24, 3 }
   0xf   : > { %p490_p7 = scmp.ge.s32.totalorder %s679_s22, 1  ;;  %p189_p9 = scmp.lt.s32.totalorder %s679_s22, 5 }
  0x10   : > { %s885_s26 = smov (%p32_p4, %s883_s26), 0  ;;  %p768_p8 = por %p154_p6, %p153_p5 }
  0x11   : > { %s132_s30 = ssub.s32 %s675_s21, %s885_s26  ;;  %s137_s5 = sadd.s32 1, %s659_s17 }
  0x12   : > { %s134_s6 = sor.u32 %s133_s27, %s132_s30  ;;  %p190_p10 = pnand %p490_p7, %p189_p9 }
  0x13   : > { %p135_p11 = scmp.eq.s32.totalorder %s134_s6, 0  ;;  %p226_p12 = scmp.lt.s32.totalorder (!%p190_p10), %s667_s19, 1  ;;  %v242_v0 = vld [vmem:[%s863_s1] sm:$0xff] (!%p190_p10)  ;;  %vm257_vm0 = vcmask (!%p190_p10), 31744   ;;  %v681_v1 = vmov (!%p190_p10), 0   ;;  %vm264_vm1 = vcmask (!%p190_p10), 1043456  }
  0x14   : > { %193 = sbr.rel (%p190_p10) target bundleno = 265 (0x109), region = 32  ;;  %p228_p13 = scmp.lt.s32.totalorder (!%p190_p10), %s663_s18, 1  ;;  %509 = vmatprep.mubr.msk.f32.mxu0 (!%p190_p10), %vm257_vm0, %v242_v0  ;;  %584 = vset.pattern.permute.xlu0 (!%p190_p10), %v681_v1  ;;  %v243_v5 = vld [vmem:[%s863_s1 + $0x8] sm:$0x3] (!%p190_p10) }
  0x15   : > { %s777_s7 = scalar_select %p135_p11, %s659_s17, %s137_s5  }
  0x16   : > { %s871_s2 = sld [smem:[#allocation6_spill]] (!%p190_p10)  ;;  %s872_s0 = sld [smem:[#allocation5_spill]] (!%p190_p10) }
  0x17   : > { %s223_s11 = sand.u32 (!%p190_p10), 1, %s655_s16  }
  0x18   : > { %s491_s14 = sshll.u32 (!%p190_p10), %s223_s11, 1 }
  0x1b   : > { %s227_s12 = scalar_select %p226_p12, %s667_s19, 1 }
  0x1c   : > { %v246_v2 = vld [vmem:[%s871_s2 + $0x8] sm:$0x3]  ;;  %s229_s13 = scalar_select %p228_p13, %s663_s18, 1  ;;  %v245_v3 = vld [vmem:[%s871_s2] sm:$0xff] }
  0x1d   : > { %254 = vperm.xlu0 %584, %v246_v2   ;;  %s492_s24 = sshll.u32 %s227_s12, 1  ;;  %s500_s12 = sshll.u32 %s667_s19, 1 }
  0x1e   : > { %s231_s27 = sadd.s32 %s492_s24, %s229_s13  ;;  %s368_s13 = sadd.s32 %s663_s18, %s500_s12 }
  0x1f   : > { %s493_s30 = sshll.u32 %s231_s27, 2  ;;  %s495_s23 = sshll.u32 %s231_s27, 3 }
  0x20   : > { %s233_s8 = scalar_lea.vmem %s872_s0, %s493_s30  ;;  %s501_s24 = sshll.u32 %s368_s13, 5 }
  0x21   : > { %249 = vperm.xlu0 %584, %v245_v3   ;;  %v244_v4 = vld [vmem:[%s233_s8] sm:$0xf]  ;;  %s225_s2 = scalar_lea.vmem [#allocation2], %s491_s14  ;;  %s241_s8 = scalar_lea.vmem %s865_s3, %s495_s23 }
  0x22   : > { %507 = vmatprep.subr.msk.mxu0 %vm264_vm1, %v244_v4  ;;  %s372_s5 = sshll.u32 %s225_s2, 4  ;;  %s809_s0 = scalar_lea.hbm %s866_s4, %s501_s24  ;;  %s811_s5 = int_to_ptr.vmem [resolvable:$true] %s372_s5 }
  0x23   : > { %508 = vmatpush3.msk.msra.mxu0 %vm264_vm1, %v244_v4  ;;  %s354_s18 = scalar_lea.sflag [#allocation3], %s223_s11  ;;  %s585_s19 = scalar_lea.vmem %s811_s5, 32 }
  0x24   : > { %510 = vmatmul.mubr.msk.f32.vlgmr.msra.gmra.mrb[0].mxu0 %vm257_vm0, %v243_v5  ;;  %p586_p0 = scmp.ne.s32.totalorder %s811_s5, %s585_s19  ;;  %s682_s27 = smov [#allocation2]  }
  0x25   : > { %s589_s14 = sshll.u32 %s682_s27, 4  ;;  %s590_s14 = int_to_ptr.vmem [resolvable:$false] %s589_s14 }
  0x26   : > { %p587_p1 = pnand %p586_p0, %p759_p3  ;;  %s591_s12 = scalar_lea.vmem %s590_s14, 64 }
  0x27   : > { %p592_p4 = scmp.lt.s32.totalorder %s811_s5, %s590_s14  ;;  %p593_p5 = scmp.lt.s32.totalorder %s591_s12, %s585_s19 }
  0x28   : > { %p588_p2 = pneg %p587_p1 }
  0x29   : > { %p594_p6 = por %p593_p5, %p592_p4 }
  0x2b   : > { %p595_p7 = pnand %p594_p6, %p588_p2 }
  0x9c   : > { %v255_v6 = vpop.permute.xlu0 %254 }
  0xa0   : > { %v250_v8 = vpop.permute.xlu0 %249 }
  0xf7   : > { %v511_v7 = vpop.f32.mrb[0].mxu0 }
  0xf8   : > { %v340_v9 = vadd.f32 %v511_v7, %v255_v6  ;;  %v334_v10 = vpop.f32.mrb[1].mxu0 }
  0xf9   : > { %v335_v11 = vadd.f32 %v334_v10, %v250_v8 }
  0xfa   : > { %344 = vst [vmem:[%s225_s2] sm:$0x3] %v340_v9 }
  0xfb   : > { %343 = vst [vmem:[%s241_s8] sm:$0x1f] %v335_v11 }
  0xfc   : > { %598 = shalt.err (!%p595_p7)
}
  0xfd   : > { %s599_s2 = scalar_lea.hbm %s809_s0, 32  ;;  %s603_s23 = scalar_lea.hbm %s866_s4, 128 }
  0xfe   : > { %p600_p9 = scmp.ne.s32.totalorder %s809_s0, %s599_s2  ;;  %p604_p12 = scmp.lt.u32.totalorder %s809_s0, %s866_s4 }
  0xff   : > { %p605_p13 = scmp.lt.u32.totalorder %s603_s23, %s599_s2  ;;  %p607_p1 = scmp.lt.u32.totalorder %s599_s2, %s809_s0 }
 0x100   : > { %p601_p10 = pnand %p600_p9, %p759_p3 }
 0x101   : > { %p606_p0 = por %p605_p13, %p604_p12 }
 0x102   : > { %p602_p11 = pneg %p601_p10 }
 0x103   : > { %p608_p2 = por %p607_p1, %p606_p0 }
 0x105   : > { %p609_p4 = pnand %p608_p2, %p602_p11 }
 0x107   : > { %612 = shalt.err (!%p609_p4)
}
 0x108   : > { %512 = dma.vmem_to_hbm [thread:$0]  (%p759_p3), %s811_s5, 32, %s809_s0, %s354_s18  }
 0x109 PF: > { %p518_p5 = scmp.ge.s32.totalorder %s679_s22, 2  ;;  %s395_s6 = sand.u32 1, %s651_s15  }
 0x10a   : > { %s396_s8 = scalar_lea.sflag [#allocation3], %s395_s6 }
 0x10b   : > { %p515_p6 = pnand %p518_p5, %p768_p8 }
 0x10d   : > { %646 = dma.done.wait (!%p515_p6), %s396_s8, 32  }
 0x10e   : > { %648 = vsyncadd (!%p515_p6), %s396_s8, 4294967264  ;;  %s18_s22 = sadd.s32 1, %s679_s22   ;;  %s873_s15 = smov %s655_s16 }
 0x10f   : > { %p15_p7 = scmp.ge.s32.totalorder %s18_s22, 6   ;;  %s874_s16 = smov %s659_s17 }
 0x110   : > { %s875_s17 = smov %s777_s7  ;;  %s876_s18 = smov %s671_s20 }
 0x111   : > { %s877_s19 = smov %s675_s21  ;;  %s878_s20 = smov %s881_s25 }
 0x112   : > { %s879_s21 = smov %s885_s26  ;;  %17 = sbr.rel (!%p15_p7) target bundleno = 8 (0x8), region = 79 }
 0x119   :  { %401 = vsyncpa [#allocation3], 1 }
 0x11a   :  { %403 = vsyncpa [#allocation3 + $0x1], 1 }

</bundles_post_ra>
